<compile_context>
chip_gen: v7x
topology: tpu7x:2x2x1
jax: 0.10.0
libtpu: 0.0.40
codegen_flags: <defaults>
</compile_context>

<pallas_src>
import functools

import jax
import jax.numpy as jnp
from jax.experimental import pallas as pl
from jax.experimental.pallas import tpu as pltpu

# ----------------------------- model config ---------------------------------
B = 2              # batch
C = 3              # image channels (encoder.C)
H = 16             # image height (encoder.H)
W = 32             # image width
WINDOW_W = 8       # window.w (cell width)
N_CELLS = W // WINDOW_W            # 4
ENC_DIM = 32       # encoder.out_ch
N_SPRITES = 5      # cfg.sprites.n (+1 empty sprite in the selection head)
P_LAYER = 6        # layer transformation parameter count (affine 2x3)
K1 = N_SPRITES + 1                 # 6 selection classes (incl. empty sprite)

R_ROWS = B * N_CELLS               # 8    batch folded into the matmul row axis
CELL_HW = H * WINDOW_W             # 128  per-cell/per-channel pixels -> lane axis
CELL_FEAT = C * CELL_HW            # 384  per-cell patch vector, (c,h,k) order
SPRITE_FEAT = (C + 1) * CELL_HW    # 512  proto channels + mask channel

# fused head / packed-stats column layout (lane-padded to 128)
HEAD_W = 128
SEL_OFF = 0                        # [ 0: 6) selection logits
LAY_OFF = K1                       # [ 6:12) layer transformation params
BKG_OFF = K1 + P_LAYER             # [12:15) background color logits
W_OFF = 32                         # [32:38) softmax weights        (packed in-kernel)
LP_OFF = 48                        # [48:54) log-probs              (packed in-kernel)
BC_OFF = 64                        # [64:67) sigmoided bkg color    (packed in-kernel)


# ------------------------------ fused kernel ---------------------------------
def _typewriter_fused_kernel(emit_visuals, patch_ref, w_enc_ref, b_enc_ref,
                             w_head_ref, b_head_ref, bank_ref, bkg_ref,
                             *out_refs):
    """Whole forward pass in one invocation; rows = B * N_CELLS."""
    if emit_visuals:
        recon_ref, bkgs_ref, fg_ref, mask_ref, stats_ref, sse_ref = out_refs
    else:
        stats_ref, sse_ref = out_refs

    patches = patch_ref[...]                                    # (R, CELL_FEAT) f32

    # ---- Encoder: one MXU matmul over K = CELL_FEAT (bf16 in, f32 accum).
    feat = jnp.dot(patches.astype(jnp.bfloat16), w_enc_ref[...],
                   preferred_element_type=jnp.float32) + b_enc_ref[...]

    # ---- Fused heads [selection | layer-tsf | bkg-color], lane-dense 128 cols.
    # Packed weight/bias columns >= 15 are zero, so heads[:, 15:] == 0 exactly;
    # the stats tile below is assembled with adds of rolled, disjointly-nonzero
    # tiles (no masked partial stores).
    heads = jnp.dot(feat.astype(jnp.bfloat16), w_head_ref[...],
                    preferred_element_type=jnp.float32) + b_head_ref[...]

    lane = jax.lax.broadcasted_iota(jnp.int32, (R_ROWS, HEAD_W), 1)
    sel_mask = (lane >= SEL_OFF) & (lane < SEL_OFF + K1)
    bkg_mask = (lane >= BKG_OFF) & (lane < BKG_OFF + C)

    # ---- Selection softmax (exact division for parity with torch.softmax).
    neg_big = jnp.float32(-1e30)
    logits_f = jnp.where(sel_mask, heads, neg_big)
    m = jnp.max(logits_f, axis=-1, keepdims=True)
    e = jnp.where(sel_mask, jnp.exp(logits_f - m), 0.0)
    denom = jnp.sum(e, axis=-1, keepdims=True)
    w_full = e / denom                                          # nonzero in [0, K1)
    lp_full = jnp.where(sel_mask, (logits_f - m) - jnp.log(denom), 0.0)

    # ---- Background color: sigmoid(mean over cells of the bkg head), per batch.
    bkg_logit_full = jnp.where(bkg_mask, heads, 0.0)
    per_batch = []
    for b in range(B):
        mb = jnp.mean(bkg_logit_full[b * N_CELLS:(b + 1) * N_CELLS],
                      axis=0, keepdims=True)                    # (1, 128)
        per_batch.append(jnp.broadcast_to(mb, (N_CELLS, HEAD_W)))
    color_full = jnp.where(bkg_mask,
                           jax.nn.sigmoid(jnp.concatenate(per_batch, axis=0)),
                           0.0)                                 # nonzero in [BKG_OFF, +C)

    # ---- Packed per-cell stats assembled in-register; one lane-dense store.
    stats_ref[...] = (heads
                      + pltpu.roll(w_full, shift=W_OFF - SEL_OFF, axis=1)
                      + pltpu.roll(lp_full, shift=LP_OFF - SEL_OFF, axis=1)
                      + pltpu.roll(color_full, shift=BC_OFF - BKG_OFF, axis=1))

    # ---- Selection sprite mix. The empty-sprite (class K1-1) proto AND mask
    # are zero by construction in the reference (not a sigmoided parameter), so
    # it contributes nothing and is dropped from the matmul.
    mix = jnp.dot(w_full[:, SEL_OFF:SEL_OFF + N_SPRITES].astype(jnp.bfloat16),
                  bank_ref[...], preferred_element_type=jnp.float32)
    # TODO(synk): Transformation.apply_parameters (affine_grid + grid_sample)
    # has no clean Pallas equivalent; sprites composited with identity transform.

    # ---- Background + layered compositing + fused MSE partial sums (f32 VPU).
    mask = mix[:, C * CELL_HW:(C + 1) * CELL_HW]                # (R, CELL_HW)
    bkg = jnp.concatenate([bkg_ref[...]] * B, axis=0)           # pre-sigmoided canvas
    sse = jnp.zeros((1, CELL_HW), jnp.float32)
    for c in range(C):
        lo = c * CELL_HW
        layer_c = mix[:, lo:lo + CELL_HW]
        col_c = color_full[:, BKG_OFF + c:BKG_OFF + c + 1]      # (R, 1)
        bkg_c = bkg[:, lo:lo + CELL_HW] * col_c
        fg_c = mask * layer_c
        rec_c = fg_c + (1.0 - mask) * bkg_c
        d = rec_c - patches[:, lo:lo + CELL_HW]
        sse = sse + jnp.sum(d * d, axis=0, keepdims=True)       # per-lane partials
        if emit_visuals:
            recon_ref[:, lo:lo + CELL_HW] = rec_c               # 128-lane aligned
            bkgs_ref[:, lo:lo + CELL_HW] = bkg_c
            fg_ref[:, lo:lo + CELL_HW] = fg_c
    if emit_visuals:
        mask_ref[...] = mask
    sse_ref[...] = sse


def _build_fused_call(emit_visuals):
    vmem = pltpu.MemorySpace.VMEM
    in_specs = [pl.BlockSpec(memory_space=vmem)] * 7
    hot_outs = (
        jax.ShapeDtypeStruct((R_ROWS, HEAD_W), jnp.float32),    # packed stats
        jax.ShapeDtypeStruct((1, CELL_HW), jnp.float32),        # SSE lane partials
    )
    vis_outs = (
        jax.ShapeDtypeStruct((R_ROWS, CELL_FEAT), jnp.float32), # reconstruction
        jax.ShapeDtypeStruct((R_ROWS, CELL_FEAT), jnp.float32), # tsf backgrounds
        jax.ShapeDtypeStruct((R_ROWS, CELL_FEAT), jnp.float32), # foreground
        jax.ShapeDtypeStruct((R_ROWS, CELL_HW), jnp.float32),   # mask
    )
    out_shape = (vis_outs + hot_outs) if emit_visuals else hot_outs
    out_specs = tuple(pl.BlockSpec(memory_space=vmem) for _ in out_shape)

    def _nbytes(sds):
        n = 1
        for d in sds.shape:
            n *= d
        return n * jnp.dtype(sds.dtype).itemsize

    flops = (2 * R_ROWS * ENC_DIM * CELL_FEAT
             + 2 * R_ROWS * HEAD_W * ENC_DIM
             + 2 * R_ROWS * N_SPRITES * SPRITE_FEAT
             + 12 * R_ROWS * C * CELL_HW)
    transcendentals = R_ROWS * (2 * HEAD_W + 1)
    in_bytes = (4 * R_ROWS * CELL_FEAT                                   # patches f32
                + 2 * (CELL_FEAT * ENC_DIM + ENC_DIM * HEAD_W
                       + N_SPRITES * SPRITE_FEAT)                        # bf16 weights
                + 4 * (ENC_DIM + HEAD_W)                                 # biases
                + 4 * N_CELLS * CELL_FEAT)                               # bkg canvas
    bytes_accessed = in_bytes + sum(_nbytes(o) for o in out_shape)

    return pl.pallas_call(
        functools.partial(_typewriter_fused_kernel, emit_visuals),
        out_shape=out_shape,
        in_specs=in_specs,
        out_specs=out_specs,
        compiler_params=pltpu.CompilerParams(
            # Explicit scoped-VMEM limit; fits every generation (<= 64 MiB v7x).
            vmem_limit_bytes=32 * 1024 * 1024),
        cost_estimate=pl.CostEstimate(flops=flops,
                                      transcendentals=transcendentals,
                                      bytes_accessed=bytes_accessed),
    )


_HOT_CALL = _build_fused_call(emit_visuals=False)   # training hot path
_VIS_CALL = _build_fused_call(emit_visuals=True)    # full diagnostics


# ------------------------------ parameters ----------------------------------
def init_params(key):
    ks = jax.random.split(key, 11)
    s = 0.1
    return {
        # Encoder (patch-embedding conv-as-matmul), rows ordered (c, h, k)
        'w_enc': s * jax.random.normal(ks[0], (CELL_FEAT, ENC_DIM), jnp.float32),
        'b_enc': s * jax.random.normal(ks[1], (1, ENC_DIM), jnp.float32),
        # Selection head
        'w_sel': s * jax.random.normal(ks[2], (ENC_DIM, K1), jnp.float32),
        'b_sel': s * jax.random.normal(ks[3], (1, K1), jnp.float32),
        # layer_transformation parameter regressor
        'w_lay': s * jax.random.normal(ks[4], (ENC_DIM, P_LAYER), jnp.float32),
        'b_lay': s * jax.random.normal(ks[5], (1, P_LAYER), jnp.float32),
        # background_transformation parameter regressor (per-batch color)
        'w_bkg': s * jax.random.normal(ks[6], (ENC_DIM, C), jnp.float32),
        'b_bkg': s * jax.random.normal(ks[7], (1, C), jnp.float32),
        # Sprites (raw logits; sigmoid applied once per call in the wrapper)
        'proto_params': s * jax.random.normal(ks[8], (N_SPRITES, C, H, WINDOW_W), jnp.float32),
        'mask_params': s * jax.random.normal(ks[9], (N_SPRITES, 1, H, WINDOW_W), jnp.float32),
        # Background canvas (raw logits)
        'background_': s * jax.random.normal(ks[10], (C, H, W), jnp.float32),
    }


# ------------------------------ forward pass ---------------------------------
@functools.partial(jax.jit, static_argnames=("return_params", "return_visuals"))
def typewriter_forward(params, img, return_params=True, return_visuals=False):
    b, c, h, w = img.shape
    n_cells = w // WINDOW_W

    # ---- layout plumbing (outside the kernel) ----
    # cell-major rows with batch folded in: row (b*n_cells + p) = flatten of
    # img[b, :, :, p*wc:(p+1)*wc] in (c, h, k) order.
    patches = (img.reshape(b, c, h, n_cells, WINDOW_W)
                  .transpose(0, 3, 1, 2, 4)
                  .reshape(b * n_cells, c * h * WINDOW_W))
    # TODO(synk): at real sizes keep activations cell-major end-to-end (fuse the
    # relayout into the producer) and cache the packed weights / pre-activated
    # sprite bank below across optimizer steps instead of per forward call.

    # fused lane-padded head weights [selection | layer-tsf | background color];
    # columns >= 15 stay zero (the kernel relies on heads[:, 15:] == 0 exactly).
    w_heads = jnp.zeros((ENC_DIM, HEAD_W), jnp.float32)
    w_heads = w_heads.at[:, SEL_OFF:SEL_OFF + K1].set(params['w_sel'])
    w_heads = w_heads.at[:, LAY_OFF:LAY_OFF + P_LAYER].set(params['w_lay'])
    w_heads = w_heads.at[:, BKG_OFF:BKG_OFF + C].set(params['w_bkg'])
    b_heads = jnp.zeros((1, HEAD_W), jnp.float32)
    b_heads = b_heads.at[:, SEL_OFF:SEL_OFF + K1].set(params['b_sel'])
    b_heads = b_heads.at[:, LAY_OFF:LAY_OFF + P_LAYER].set(params['b_lay'])
    b_heads = b_heads.at[:, BKG_OFF:BKG_OFF + C].set(params['b_bkg'])

    # batch-invariant activations hoisted out of the kernel (computed once).
    bank_sig = jax.nn.sigmoid(jnp.concatenate(
        [params['proto_params'].reshape(N_SPRITES, -1),
         params['mask_params'].reshape(N_SPRITES, -1)], axis=1))      # (5, 512)
    bkg_sig = jax.nn.sigmoid(
        params['background_'].reshape(c, h, n_cells, WINDOW_W)
        .transpose(2, 0, 1, 3).reshape(n_cells, c * h * WINDOW_W))    # (4, 384)

    # bf16 MXU operands (f32 accumulation in-kernel); VPU/compositor math stays f32.
    args = (patches,
            params['w_enc'].astype(jnp.bfloat16),
            params['b_enc'],
            w_heads.astype(jnp.bfloat16),
            b_heads,
            bank_sig.astype(jnp.bfloat16),
            bkg_sig)

    if return_visuals:
        recon_c, bkgs_c, fg_c, mask_c, stats, sse = _VIS_CALL(*args)
    else:
        stats, sse = _HOT_CALL(*args)

    recon_loss = jnp.sum(sse) / float(img.size)
    y = {'loss': recon_loss, 'reconstruction_loss': recon_loss}
    # TODO(synk): CTC / overlap regularizers of Loss are not reproduced.

    if return_params:
        layer_params = (stats[:, LAY_OFF:LAY_OFF + P_LAYER]
                        .reshape(b, n_cells, P_LAYER)
                        .transpose(0, 2, 1))                          # (B, P, n_cells)
        bkg_color = stats.reshape(b, n_cells, HEAD_W)[:, 0, BC_OFF:BC_OFF + C]
        y['params'] = {'sprites': layer_params[None],                 # (1, B, P, n_cells)
                       'background': bkg_color}                       # (B, C)

    y['_logits'] = stats[:, SEL_OFF:SEL_OFF + K1].reshape(b, n_cells, K1)
    y['_w'] = stats[:, W_OFF:W_OFF + K1].reshape(b, n_cells, K1)
    y['_log_probs'] = stats[:, LP_OFF:LP_OFF + K1].reshape(b, n_cells, K1)

    if return_visuals:
        def cells_to_img(x_cells, ch):
            return (x_cells.reshape(b, n_cells, ch, h, WINDOW_W)
                           .transpose(0, 2, 3, 1, 4).reshape(b, ch, h, w))
        y['_reconstruction'] = cells_to_img(recon_c, c)
        y['_tsf_bkgs'] = cells_to_img(bkgs_c, c)
        y['_cur_foreground'] = cells_to_img(fg_c, c)
        y['_cur_mask'] = cells_to_img(mask_c, 1)
    return y


# --------------------------------- main --------------------------------------
if __name__ == "__main__":
    key = jax.random.PRNGKey(0)
    pkey, xkey = jax.random.split(key)
    params = init_params(pkey)
    x = jax.random.uniform(xkey, (B, C, H, W), dtype=jnp.float32)

    # Training hot path: packed stats + fused SSE only (no diagnostic writeback).
    y_hot = typewriter_forward(params, x, return_params=True, return_visuals=False)
    jax.block_until_ready(y_hot['loss'])

    # Full diagnostics path (reconstruction / backgrounds / foreground / mask).
    y = typewriter_forward(params, x, return_params=True, return_visuals=True)
    jax.block_until_ready(y['loss'])
    jax.block_until_ready(y['_reconstruction'])
    print("KERNEL_OK")
</pallas_src>

<mosaic_0001>
module attributes {stable_mosaic.version = 11 : i64} {
  func.func @_typewriter_fused_kernel(%arg0: memref<8x384xf32, #tpu.memory_space<vmem>>, %arg1: memref<384x32xbf16, #tpu.memory_space<vmem>>, %arg2: memref<1x32xf32, #tpu.memory_space<vmem>>, %arg3: memref<32x128xbf16, #tpu.memory_space<vmem>>, %arg4: memref<1x128xf32, #tpu.memory_space<vmem>>, %arg5: memref<5x512xbf16, #tpu.memory_space<vmem>>, %arg6: memref<4x384xf32, #tpu.memory_space<vmem>>, %arg7: memref<8x128xf32, #tpu.memory_space<vmem>>, %arg8: memref<1x128xf32, #tpu.memory_space<vmem>>) attributes {dimension_semantics = [], scalar_prefetch = 0 : i64, scratch_operands = 0 : i64, tpu.core_type = #tpu.core_type<tc>} {
    %c0 = arith.constant 0 : index
    %c0_0 = arith.constant 0 : index
    %0 = vector.load %arg0[%c0, %c0_0] : memref<8x384xf32, #tpu.memory_space<vmem>>, vector<8x384xf32>
    %1 = arith.truncf %0 : vector<8x384xf32> to vector<8x384xbf16>
    %c0_1 = arith.constant 0 : index
    %c0_2 = arith.constant 0 : index
    %2 = vector.load %arg1[%c0_1, %c0_2] : memref<384x32xbf16, #tpu.memory_space<vmem>>, vector<384x32xbf16>
    %cst = arith.constant dense<0.000000e+00> : vector<8x32xf32>
    %3 = tpu.matmul %1, %2, %cst {dimension_numbers = #tpu.dot_dimension_numbers<[1], [0], [0], [1], [0, 0, 1, 1], [], []>} : vector<8x384xbf16>, vector<384x32xbf16>, vector<8x32xf32> -> vector<8x32xf32>
    %c0_3 = arith.constant 0 : index
    %c0_4 = arith.constant 0 : index
    %4 = vector.load %arg2[%c0_3, %c0_4] : memref<1x32xf32, #tpu.memory_space<vmem>>, vector<1x32xf32>
    %5 = vector.broadcast %4 : vector<1x32xf32> to vector<8x32xf32>
    %6 = arith.addf %3, %5 : vector<8x32xf32>
    %7 = arith.truncf %6 : vector<8x32xf32> to vector<8x32xbf16>
    %c0_5 = arith.constant 0 : index
    %c0_6 = arith.constant 0 : index
    %8 = vector.load %arg3[%c0_5, %c0_6] : memref<32x128xbf16, #tpu.memory_space<vmem>>, vector<32x128xbf16>
    %cst_7 = arith.constant dense<0.000000e+00> : vector<8x128xf32>
    %9 = tpu.matmul %7, %8, %cst_7 {dimension_numbers = #tpu.dot_dimension_numbers<[1], [0], [0], [1], [0, 0, 1, 1], [], []>} : vector<8x32xbf16>, vector<32x128xbf16>, vector<8x128xf32> -> vector<8x128xf32>
    %c0_8 = arith.constant 0 : index
    %c0_9 = arith.constant 0 : index
    %10 = vector.load %arg4[%c0_8, %c0_9] : memref<1x128xf32, #tpu.memory_space<vmem>>, vector<1x128xf32>
    %11 = vector.broadcast %10 : vector<1x128xf32> to vector<8x128xf32>
    %12 = arith.addf %9, %11 : vector<8x128xf32>
    %13 = tpu.iota {dimensions = array<i32: 1>} : vector<8x128xi32>
    %c0_i32 = arith.constant 0 : i32
    %14 = vector.broadcast %c0_i32 : i32 to vector<8x128xi32>
    %15 = arith.cmpi sge, %13, %14 : vector<8x128xi32>
    %c6_i32 = arith.constant 6 : i32
    %16 = vector.broadcast %c6_i32 : i32 to vector<8x128xi32>
    %17 = arith.cmpi slt, %13, %16 : vector<8x128xi32>
    %18 = arith.andi %15, %17 : vector<8x128xi1>
    %c12_i32 = arith.constant 12 : i32
    %19 = vector.broadcast %c12_i32 : i32 to vector<8x128xi32>
    %20 = arith.cmpi sge, %13, %19 : vector<8x128xi32>
    %c15_i32 = arith.constant 15 : i32
    %21 = vector.broadcast %c15_i32 : i32 to vector<8x128xi32>
    %22 = arith.cmpi slt, %13, %21 : vector<8x128xi32>
    %23 = arith.andi %20, %22 : vector<8x128xi1>
    %cst_10 = arith.constant -1.000000e+30 : f32
    %24 = vector.broadcast %cst_10 : f32 to vector<8x128xf32>
    %25 = arith.select %18, %12, %24 : vector<8x128xi1>, vector<8x128xf32>
    %cst_11 = arith.constant dense<0xFF800000> : vector<8xf32>
    %26 = vector.multi_reduction <maximumf>, %25, %cst_11 [1] : vector<8x128xf32> to vector<8xf32>
    %27 = vector.shape_cast %26 : vector<8xf32> to vector<8x1xf32>
    %28 = vector.broadcast %27 : vector<8x1xf32> to vector<8x128xf32>
    %29 = arith.subf %25, %28 : vector<8x128xf32>
    %30 = math.exp %29 : vector<8x128xf32>
    %cst_12 = arith.constant 0.000000e+00 : f32
    %31 = vector.broadcast %cst_12 : f32 to vector<8x128xf32>
    %32 = arith.select %18, %30, %31 : vector<8x128xi1>, vector<8x128xf32>
    %cst_13 = arith.constant dense<0.000000e+00> : vector<8xf32>
    %33 = vector.multi_reduction <add>, %32, %cst_13 [1] : vector<8x128xf32> to vector<8xf32>
    %34 = vector.shape_cast %33 : vector<8xf32> to vector<8x1xf32>
    %35 = vector.broadcast %34 : vector<8x1xf32> to vector<8x128xf32>
    %36 = arith.divf %32, %35 : vector<8x128xf32>
    %37 = vector.broadcast %27 : vector<8x1xf32> to vector<8x128xf32>
    %38 = arith.subf %25, %37 : vector<8x128xf32>
    %39 = math.log %34 : vector<8x1xf32>
    %40 = vector.broadcast %39 : vector<8x1xf32> to vector<8x128xf32>
    %41 = arith.subf %38, %40 : vector<8x128xf32>
    %cst_14 = arith.constant 0.000000e+00 : f32
    %42 = vector.broadcast %cst_14 : f32 to vector<8x128xf32>
    %43 = arith.select %18, %41, %42 : vector<8x128xi1>, vector<8x128xf32>
    %cst_15 = arith.constant 0.000000e+00 : f32
    %44 = vector.broadcast %cst_15 : f32 to vector<8x128xf32>
    %45 = arith.select %23, %12, %44 : vector<8x128xi1>, vector<8x128xf32>
    %46 = vector.extract_strided_slice %45 {offsets = [0, 0], sizes = [4, 128], strides = [1, 1]} : vector<8x128xf32> to vector<4x128xf32>
    %cst_16 = arith.constant dense<0.000000e+00> : vector<128xf32>
    %47 = vector.multi_reduction <add>, %46, %cst_16 [0] : vector<4x128xf32> to vector<128xf32>
    %48 = vector.shape_cast %47 : vector<128xf32> to vector<1x128xf32>
    %cst_17 = arith.constant 4.000000e+00 : f32
    %49 = vector.broadcast %cst_17 : f32 to vector<1x128xf32>
    %50 = arith.divf %48, %49 : vector<1x128xf32>
    %51 = vector.shape_cast %50 : vector<1x128xf32> to vector<1x128xf32>
    %52 = vector.broadcast %51 : vector<1x128xf32> to vector<4x128xf32>
    %53 = vector.extract_strided_slice %45 {offsets = [4, 0], sizes = [4, 128], strides = [1, 1]} : vector<8x128xf32> to vector<4x128xf32>
    %cst_18 = arith.constant dense<0.000000e+00> : vector<128xf32>
    %54 = vector.multi_reduction <add>, %53, %cst_18 [0] : vector<4x128xf32> to vector<128xf32>
    %55 = vector.shape_cast %54 : vector<128xf32> to vector<1x128xf32>
    %cst_19 = arith.constant 4.000000e+00 : f32
    %56 = vector.broadcast %cst_19 : f32 to vector<1x128xf32>
    %57 = arith.divf %55, %56 : vector<1x128xf32>
    %58 = vector.shape_cast %57 : vector<1x128xf32> to vector<1x128xf32>
    %59 = vector.broadcast %58 : vector<1x128xf32> to vector<4x128xf32>
    %60 = tpu.concatenate %52, %59 in 0 : vector<4x128xf32>, vector<4x128xf32> -> vector<8x128xf32>
    %61 = arith.negf %60 : vector<8x128xf32>
    %62 = math.exp %61 : vector<8x128xf32>
    %cst_20 = arith.constant 1.000000e+00 : f32
    %63 = vector.broadcast %cst_20 : f32 to vector<8x128xf32>
    %64 = arith.addf %63, %62 : vector<8x128xf32>
    %65 = arith.divf %63, %64 : vector<8x128xf32>
    %cst_21 = arith.constant 0.000000e+00 : f32
    %66 = vector.broadcast %cst_21 : f32 to vector<8x128xf32>
    %67 = arith.select %23, %65, %66 : vector<8x128xi1>, vector<8x128xf32>
    %c32_i32 = arith.constant 32 : i32
    %68 = tpu.dynamic_rotate %36 by %c32_i32 dim 1 : vector<8x128xf32>, i32 -> vector<8x128xf32>
    %69 = arith.addf %12, %68 : vector<8x128xf32>
    %c48_i32 = arith.constant 48 : i32
    %70 = tpu.dynamic_rotate %43 by %c48_i32 dim 1 : vector<8x128xf32>, i32 -> vector<8x128xf32>
    %71 = arith.addf %69, %70 : vector<8x128xf32>
    %c52_i32 = arith.constant 52 : i32
    %72 = tpu.dynamic_rotate %67 by %c52_i32 dim 1 : vector<8x128xf32>, i32 -> vector<8x128xf32>
    %73 = arith.addf %71, %72 : vector<8x128xf32>
    %c0_22 = arith.constant 0 : index
    %c0_23 = arith.constant 0 : index
    %74 = vector.load %arg7[%c0_22, %c0_23] : memref<8x128xf32, #tpu.memory_space<vmem>>, vector<8x128xf32>
    tpu.vector_store %arg7[%c0_22, %c0_23], %73 {strides = array<i32>} : memref<8x128xf32, #tpu.memory_space<vmem>>, vector<8x128xf32>,
    %75 = vector.extract_strided_slice %36 {offsets = [0, 0], sizes = [8, 5], strides = [1, 1]} : vector<8x128xf32> to vector<8x5xf32>
    %76 = arith.truncf %75 : vector<8x5xf32> to vector<8x5xbf16>
    %c0_24 = arith.constant 0 : index
    %c0_25 = arith.constant 0 : index
    %77 = vector.load %arg5[%c0_24, %c0_25] : memref<5x512xbf16, #tpu.memory_space<vmem>>, vector<5x512xbf16>
    %cst_26 = arith.constant dense<0.000000e+00> : vector<8x512xf32>
    %78 = tpu.matmul %76, %77, %cst_26 {dimension_numbers = #tpu.dot_dimension_numbers<[1], [0], [0], [1], [0, 0, 1, 1], [], []>} : vector<8x5xbf16>, vector<5x512xbf16>, vector<8x512xf32> -> vector<8x512xf32>
    %79 = vector.extract_strided_slice %78 {offsets = [0, 384], sizes = [8, 128], strides = [1, 1]} : vector<8x512xf32> to vector<8x128xf32>
    %c0_27 = arith.constant 0 : index
    %c0_28 = arith.constant 0 : index
    %80 = vector.load %arg6[%c0_27, %c0_28] : memref<4x384xf32, #tpu.memory_space<vmem>>, vector<4x384xf32>
    %81 = tpu.concatenate %80, %80 in 0 : vector<4x384xf32>, vector<4x384xf32> -> vector<8x384xf32>
    %cst_29 = arith.constant 0.000000e+00 : f32
    %82 = vector.broadcast %cst_29 : f32 to vector<1x128xf32>
    %83 = vector.extract_strided_slice %78 {offsets = [0, 0], sizes = [8, 128], strides = [1, 1]} : vector<8x512xf32> to vector<8x128xf32>
    %84 = vector.extract_strided_slice %67 {offsets = [0, 12], sizes = [8, 1], strides = [1, 1]} : vector<8x128xf32> to vector<8x1xf32>
    %85 = vector.extract_strided_slice %81 {offsets = [0, 0], sizes = [8, 128], strides = [1, 1]} : vector<8x384xf32> to vector<8x128xf32>
    %86 = vector.broadcast %84 : vector<8x1xf32> to vector<8x128xf32>
    %87 = arith.mulf %85, %86 : vector<8x128xf32>
    %88 = arith.mulf %79, %83 : vector<8x128xf32>
    %cst_30 = arith.constant 1.000000e+00 : f32
    %89 = vector.broadcast %cst_30 : f32 to vector<8x128xf32>
    %90 = arith.subf %89, %79 : vector<8x128xf32>
    %91 = arith.mulf %90, %87 : vector<8x128xf32>
    %92 = arith.addf %88, %91 : vector<8x128xf32>
    %93 = vector.extract_strided_slice %0 {offsets = [0, 0], sizes = [8, 128], strides = [1, 1]} : vector<8x384xf32> to vector<8x128xf32>
    %94 = arith.subf %92, %93 : vector<8x128xf32>
    %95 = arith.mulf %94, %94 : vector<8x128xf32>
    %cst_31 = arith.constant dense<0.000000e+00> : vector<128xf32>
    %96 = vector.multi_reduction <add>, %95, %cst_31 [0] : vector<8x128xf32> to vector<128xf32>
    %97 = vector.shape_cast %96 : vector<128xf32> to vector<1x128xf32>
    %98 = arith.addf %82, %97 : vector<1x128xf32>
    %99 = vector.extract_strided_slice %78 {offsets = [0, 128], sizes = [8, 128], strides = [1, 1]} : vector<8x512xf32> to vector<8x128xf32>
    %100 = vector.extract_strided_slice %67 {offsets = [0, 13], sizes = [8, 1], strides = [1, 1]} : vector<8x128xf32> to vector<8x1xf32>
    %101 = vector.extract_strided_slice %81 {offsets = [0, 128], sizes = [8, 128], strides = [1, 1]} : vector<8x384xf32> to vector<8x128xf32>
    %102 = vector.broadcast %100 : vector<8x1xf32> to vector<8x128xf32>
    %103 = arith.mulf %101, %102 : vector<8x128xf32>
    %104 = arith.mulf %79, %99 : vector<8x128xf32>
    %cst_32 = arith.constant 1.000000e+00 : f32
    %105 = vector.broadcast %cst_32 : f32 to vector<8x128xf32>
    %106 = arith.subf %105, %79 : vector<8x128xf32>
    %107 = arith.mulf %106, %103 : vector<8x128xf32>
    %108 = arith.addf %104, %107 : vector<8x128xf32>
    %109 = vector.extract_strided_slice %0 {offsets = [0, 128], sizes = [8, 128], strides = [1, 1]} : vector<8x384xf32> to vector<8x128xf32>
    %110 = arith.subf %108, %109 : vector<8x128xf32>
    %111 = arith.mulf %110, %110 : vector<8x128xf32>
    %cst_33 = arith.constant dense<0.000000e+00> : vector<128xf32>
    %112 = vector.multi_reduction <add>, %111, %cst_33 [0] : vector<8x128xf32> to vector<128xf32>
    %113 = vector.shape_cast %112 : vector<128xf32> to vector<1x128xf32>
    %114 = arith.addf %98, %113 : vector<1x128xf32>
    %115 = vector.extract_strided_slice %78 {offsets = [0, 256], sizes = [8, 128], strides = [1, 1]} : vector<8x512xf32> to vector<8x128xf32>
    %116 = vector.extract_strided_slice %67 {offsets = [0, 14], sizes = [8, 1], strides = [1, 1]} : vector<8x128xf32> to vector<8x1xf32>
    %117 = vector.extract_strided_slice %81 {offsets = [0, 256], sizes = [8, 128], strides = [1, 1]} : vector<8x384xf32> to vector<8x128xf32>
    %118 = vector.broadcast %116 : vector<8x1xf32> to vector<8x128xf32>
    %119 = arith.mulf %117, %118 : vector<8x128xf32>
    %120 = arith.mulf %79, %115 : vector<8x128xf32>
    %cst_34 = arith.constant 1.000000e+00 : f32
    %121 = vector.broadcast %cst_34 : f32 to vector<8x128xf32>
    %122 = arith.subf %121, %79 : vector<8x128xf32>
    %123 = arith.mulf %122, %119 : vector<8x128xf32>
    %124 = arith.addf %120, %123 : vector<8x128xf32>
    %125 = vector.extract_strided_slice %0 {offsets = [0, 256], sizes = [8, 128], strides = [1, 1]} : vector<8x384xf32> to vector<8x128xf32>
    %126 = arith.subf %124, %125 : vector<8x128xf32>
    %127 = arith.mulf %126, %126 : vector<8x128xf32>
    %cst_35 = arith.constant dense<0.000000e+00> : vector<128xf32>
    %128 = vector.multi_reduction <add>, %127, %cst_35 [0] : vector<8x128xf32> to vector<128xf32>
    %129 = vector.shape_cast %128 : vector<128xf32> to vector<1x128xf32>
    %130 = arith.addf %114, %129 : vector<1x128xf32>
    %c0_36 = arith.constant 0 : index
    %c0_37 = arith.constant 0 : index
    %131 = vector.load %arg8[%c0_36, %c0_37] : memref<1x128xf32, #tpu.memory_space<vmem>>, vector<1x128xf32>
    tpu.vector_store %arg8[%c0_36, %c0_37], %130 {strides = array<i32>} : memref<1x128xf32, #tpu.memory_space<vmem>>, vector<1x128xf32>,
    return
  }
}

</mosaic_0001>

<bundles_post_ra>
// kernel: typewriter_forward.1
= control target key start
LH: loop header
LB: loop body
LE: loop exit
PB: predicated region body
PF: predicated region fallthrough
CT: control target
= control target key end

     0   :  { %v789_v1 = vmov 0.0   ;;  %vm790_vm0 = vmmov 0   ;;  %vm338_vm1 = vcmask 261120   ;;  %v791_v46 = vmov 12   ;;  %s797_s22 = smov 48   ;;  %s798_s23 = smov 52   ;;  %s1014_s1 = inlined_call_operand.vmem [shape: bf16[384,32], index: 1, kind: input, shape index: {}]   ;;  %s1015_s0 = inlined_call_operand.vmem [shape: f32[8,384], index: 0, kind: input, shape index: {}]   ;;  %s1016_s3 = inlined_call_operand.vmem [shape: bf16[32,128], index: 3, kind: input, shape index: {}]   ;;  %s1017_s2 = inlined_call_operand.vmem [shape: f32[1,32], index: 2, kind: input, shape index: {}]   ;;  %s1018_s4 = inlined_call_operand.vmem [shape: f32[1,128], index: 4, kind: input, shape index: {}]   ;;  %s1019_s5 = inlined_call_operand.vmem [shape: bf16[5,512], index: 5, kind: input, shape index: {}]   ;;  %s1020_s7 = inlined_call_operand.vmem [shape: f32[8,128], index: 7, kind: output, shape index: {0}]   ;;  %s1021_s6 = inlined_call_operand.vmem [shape: f32[4,384], index: 6, kind: input, shape index: {}]   ;;  %s1022_s8 = inlined_call_operand.vmem [shape: f32[1,128], index: 8, kind: output, shape index: {1}]  }
   0x1   :  { %v746_v0 = vld [vmem:[%s1014_s1 + $0x40] sm:$0xff]   ;;  %705 = vmatprep.subr.bf16.mxu1 %v789_v1  ;;  %721 = vmatprep.mubr.msk.bf16.mxu1 %vm790_vm0, %v789_v1  ;;  %v749_v4 = vld [vmem:[%s1014_s1 + $0x48] sm:$0xff]   ;;  %v752_v7 = vld [vmem:[%s1014_s1 + $0x50] sm:$0xff]   ;;  %v382_v47 = vlaneseq  ;;  %vm406_vm6 = vcmask 1043456   ;;  %vm462_vm7 = vcmask 1041408   ;;  %vm463_vm8 = vcmask 1042432  }
   0x2   :  { %v747_v2 = vld [vmem:[%s1014_s1] sm:$0xff]   ;;  %671 = vmatprep.subr.bf16.mxu0 %v746_v0  ;;  %v750_v5 = vld [vmem:[%s1014_s1 + $0x8] sm:$0xff]   ;;  %v753_v8 = vld [vmem:[%s1014_s1 + $0x10] sm:$0xff]   ;;  %743 = vset.pattern.permute.xlu1 %v791_v46  ;;  %vm458_vm9 = vcmask 39936  }
   0x3   :  { %v748_v3 = vld [vmem:[%s1014_s1 + $0x80] sm:$0xff]   ;;  %672 = vmatpush3.bf16.msra.mxu0 %v747_v2  ;;  %v751_v6 = vld [vmem:[%s1014_s1 + $0x88] sm:$0xff]   ;;  %v754_v9 = vld [vmem:[%s1014_s1 + $0x90] sm:$0xff]   ;;  %v960_v48 = vand.u32 127, %v382_v47 }
   0x4   :  { %706 = vmatpush3.bf16.msra.mxu1 %v748_v3  ;;  %673 = vmatprep.subr.bf16.mxu0 %v749_v4  ;;  %v755_v10 = vld [vmem:[%s1014_s1 + $0x58] sm:$0xff]   ;;  %v758_v13 = vld [vmem:[%s1014_s1 + $0x60] sm:$0xff]   ;;  %v761_v16 = vld [vmem:[%s1014_s1 + $0x68] sm:$0xff]  }
   0x5   :  { %707 = vmatprep.subr.bf16.mxu1 %v789_v1  ;;  %v756_v11 = vld [vmem:[%s1014_s1 + $0x18] sm:$0xff]   ;;  %v759_v14 = vld [vmem:[%s1014_s1 + $0x20] sm:$0xff]   ;;  %v762_v17 = vld [vmem:[%s1014_s1 + $0x28] sm:$0xff]   ;;  %vm387_vm2 = vcmp.ge.s32.totalorder %v960_v48, 12  ;;  %vm388_vm3 = vcmp.lt.s32.totalorder %v960_v48, 15  ;;  %vm385_vm4 = vcmp.lt.s32.totalorder %v960_v48, 6 }
   0x6   :  { %v757_v12 = vld [vmem:[%s1014_s1 + $0x98] sm:$0xff]   ;;  %v760_v15 = vld [vmem:[%s1014_s1 + $0xa0] sm:$0xff]   ;;  %v763_v18 = vld [vmem:[%s1014_s1 + $0xa8] sm:$0xff]  }
   0x7   :  { %674 = vmatpush3.bf16.msra.mxu0 %v750_v5  ;;  %v764_v19 = vld [vmem:[%s1014_s1 + $0x70] sm:$0xff]   ;;  %v915_v21 = vld [vmem:[%s1015_s0 + $0x8] sm:$0xff]  ;;  %v767_v23 = vld [vmem:[%s1014_s1 + $0x78] sm:$0xff]  }
   0x8   :  { %708 = vmatpush3.bf16.msra.mxu1 %v751_v6  ;;  %675 = vmatprep.subr.bf16.mxu0 %v752_v7  ;;  %v765_v20 = vld [vmem:[%s1014_s1 + $0x30] sm:$0xff]   ;;  %v33_v24 = vpack.c.bf16 %v915_v21, %v915_v21  ;;  %v768_v25 = vld [vmem:[%s1014_s1 + $0x38] sm:$0xff]   ;;  %v932_v26 = vld [vmem:[%s1015_s0] sm:$0xff] }
   0x9   :  { %709 = vmatprep.subr.bf16.mxu1 %v789_v1  ;;  %v766_v22 = vld [vmem:[%s1014_s1 + $0xb0] sm:$0xff]   ;;  %v769_v27 = vld [vmem:[%s1014_s1 + $0xb8] sm:$0xff]   ;;  %v32_v29 = vpack.c.bf16 %v932_v26, %v932_v26  ;;  %v770_v31 = vld [vmem:[%s1016_s3] sm:$0xff]  }
   0xa   :  { %266 = vmatprep.mubr.bf16.mxu0 %v33_v24  ;;  %v940_v28 = vld [vmem:[%s1015_s0 + $0x10] sm:$0xff]  ;;  %v771_v32 = vld [vmem:[%s1016_s3 + $0x8] sm:$0xff]   ;;  %v635_v35 = vld [vmem:[%s1017_s2] ss:$0 sm:$0xff] }
   0xb   :  { %676 = vmatpush3.bf16.msra.mxu0 %v753_v8  ;;  %v34_v30 = vpack.c.bf16 %v940_v28, %v940_v28  ;;  %v660_v49 = vld [vmem:[%s1018_s4] ss:$0 sm:$0xff]  ;;  %vm968_vm5 = vmand %vm387_vm2, %vm388_vm3 }
   0xc   :  { %710 = vmatpush3.bf16.msra.mxu1 %v754_v9  ;;  %677 = vmatprep.subr.bf16.mxu0 %v755_v10  ;;  %v560_v48 = vld [vmem:[%s1021_s6] sm:$0xff] }
   0xd   :  { %711 = vmatprep.subr.bf16.mxu1 %v789_v1 }
   0xf   :  { %678 = vmatpush3.bf16.msra.mxu0 %v756_v11 }
  0x10   :  { %712 = vmatpush3.bf16.msra.mxu1 %v757_v12  ;;  %679 = vmatprep.subr.bf16.mxu0 %v758_v13 }
  0x11   :  { %713 = vmatprep.subr.bf16.mxu1 %v789_v1 }
  0x13   :  { %680 = vmatpush3.bf16.msra.mxu0 %v759_v14 }
  0x14   :  { %714 = vmatpush3.bf16.msra.mxu1 %v760_v15  ;;  %681 = vmatprep.subr.bf16.mxu0 %v761_v16 }
  0x15   :  { %715 = vmatprep.subr.bf16.mxu1 %v789_v1 }
  0x17   :  { %682 = vmatpush3.bf16.msra.mxu0 %v762_v17  ;;  %v792_v17 = vmov 13  }
  0x18   :  { %716 = vmatpush3.bf16.msra.mxu1 %v763_v18  ;;  %683 = vmatprep.subr.bf16.mxu0 %v764_v19  ;;  %v793_v18 = vmov 14  }
  0x19   :  { %717 = vmatprep.subr.bf16.mxu1 %v789_v1  ;;  %745 = vset.pattern.permute.xlu0 %v793_v18 }
  0x1b   :  { %684 = vmatpush3.bf16.msra.mxu0 %v765_v20 }
  0x1c   :  { %718 = vmatpush3.bf16.msra.mxu1 %v766_v22  ;;  %685 = vmatprep.subr.bf16.mxu0 %v767_v23 }
  0x1d   :  { %719 = vmatprep.subr.bf16.mxu1 %v789_v1 }
  0x1f   :  { %686 = vmatpush3.bf16.msra.mxu0 %v768_v25  ;;  %v447_v25 = vld [vmem:[%s1019_s5 + $0x8] sm:$0x77] }
  0x20   :  { %720 = vmatpush3.bf16.msra.mxu1 %v769_v27  ;;  %725 = vmatprep.subr.bf16.mxu0 %v789_v1  ;;  %v446_v27 = vld [vmem:[%s1019_s5] sm:$0x77]  ;;  %s796_s5 = smov 32  }
  0x22   :  { %267 = vmatmul.mubr.bf16.vlgmr.msra.gmra.mrb[0].mxu0 %v32_v29  ;;  %v668_v29 = vcombine.high %v447_v25, %v447_v25 }
  0x23   :  { %722 = vmatmul.mubr.bf16.vlgmr.msra.gmra.mrb[0].mxu1 %v34_v30  ;;  %729 = vmatprep.mubr.msk.bf16.mxu0 %vm790_vm0, %v789_v1  ;;  %v794_v30 = vmov 65535  }
  0x24   :  { %726 = vmatpush3.bf16.msra.mxu0 %v770_v31  ;;  %v464_v31 = vsel %vm462_vm7, 4294967295, %v794_v30 }
  0x25   :  { %727 = vmatprep.subr.bf16.mxu0 %v789_v1 }
  0x28   :  { %728 = vmatpush3.bf16.msra.mxu0 %v771_v32  ;;  %v667_v32 = vcombine.low %v447_v25, %v447_v25 }
  0xf5   :  { %v687_v33 = vpop.f32.mrb[0].mxu0 }
  0xf6   :  { %v688_v34 = vpop.f32.mrb[1].mxu0  ;;  %v308_v36 = vpop.f32.mrb[0].mxu1 }
  0xf7   :  { %v689_v37 = vadd.f32 %v688_v34, %v687_v33  ;;  %v690_v38 = vpop.f32.mrb[2].mxu0  ;;  %v723_v39 = vpop.f32.mrb[1].mxu1  ;;  %v465_v33 = vsel %vm463_vm8, %v464_v31, 0  ;;  %v665_v34 = vcombine.low %v446_v27, %v446_v27 }
  0xf8   :  { %v691_v40 = vpop.f32.mrb[3].mxu0  ;;  %v311_v41 = vpop.f32.mrb[2].mxu1 }
  0xf9   :  { %v269_v42 = vadd.f32 %v689_v37, %v635_v35  ;;  %v724_v43 = vpop.f32.mrb[3].mxu1  ;;  %v666_v35 = vcombine.high %v446_v27, %v446_v27  ;;  %v473_v37 = vand.u32 %v667_v32, %v465_v33  ;;  %v467_v39 = vand.u32 %v665_v34, %v465_v33 }
  0xfa   :  { %v795_v40 = vmov 0  }
  0xfb   :  { %v309_v44 = vadd.f32 %v308_v36, %v269_v42  ;;  %v476_v36 = vand.u32 %v668_v29, %v465_v33  ;;  %v470_v38 = vand.u32 %v666_v35, %v465_v33  ;;  %510 = vmatprep.mubr.bf16.mxu1 %v795_v40 }
  0xfd   :  { %v314_v45 = vpack.c.bf16 %v309_v44, %v309_v44  ;;  %519 = vmatprep.subr.bf16.mxu0 %v476_v36  ;;  %478 = vmatprep.subr.bf16.mxu1 %v470_v38 }
  0xfe   :  { %479 = vmatpush1.bf16.msra.mxu1 %v467_v39 }
  0xff   :  { %730 = vmatmul.mubr.msk.bf16.vlgmr.msra.gmra.mrb[4].mxu0 %vm338_vm1, %v314_v45 }
 0x100   :  { %520 = vmatpush1.bf16.msra.mxu0 %v473_v37  ;;  %551 = vmatprep.mubr.bf16.mxu0 %v795_v40 }
 0x1d2   :  { %v376_v50 = vpop.f32.mrb[4].mxu0 }
 0x1d3   :  { %v972_v52 = vadd.f32 %v660_v49, %v376_v50  ;;  %v731_v53 = vpop.f32.mrb[5].mxu0 }
 0x1d4   :  { %v379_v54 = vpop.f32.mrb[6].mxu0 }
 0x1d5   :  { %v732_v55 = vpop.f32.mrb[7].mxu0  ;;  %v390_v56 = vsel %vm385_vm4, %v972_v52, -1e+30  ;;  %v405_v57 = vsel %vm968_vm5, %v972_v52, 0.0 }
 0x1d6   :  { %391 = vmax.xlane.f32.xlu0 %v390_v56  ;;  %v407_v58 = vsel %vm406_vm6, %v405_v57, 0.0  ;;  %v417_v59 = vrot.slane %v405_v57, 4 }
 0x1d7   :  { %v408_v60 = vrot.slane %v407_v58, 4 }
 0x1d8   :  { %v419_v61 = vsel %vm406_vm6, %v417_v59, 0.0  ;;  %v561_v59 = vld [vmem:[%s1021_s6 + $0x8] sm:$0xf] }
 0x1d9   :  { %v409_v62 = vadd.f32 %v408_v60, %v407_v58  ;;  %v420_v63 = vrot.slane %v419_v61, 4  ;;  %v566_v60 = vcombine.low %v560_v48, %v560_v48 }
 0x1db   :  { %v410_v0 = vrot.slane %v409_v62, 2  ;;  %v421_v1 = vadd.f32 %v420_v63, %v419_v61  ;;  %v564_v61 = vcombine.high %v560_v48, %v560_v48 }
 0x1dd   :  { %v411_v2 = vadd.f32 %v410_v0, %v409_v62  ;;  %v422_v3 = vrot.slane %v421_v1, 2  ;;  %v567_v62 = vcombine.low %v561_v59, %v561_v59  ;;  %v571_v63 = vsel %vm406_vm6, %v564_v61, %v560_v48 }
 0x1df   :  { %v412_v4 = vrot.slane %v411_v2, 1  ;;  %v423_v5 = vadd.f32 %v422_v3, %v421_v1  ;;  %v572_v0 = vsel %vm406_vm6, %v561_v59, %v567_v62 }
 0x1e1   :  { %v413_v6 = vadd.f32 %v412_v4, %v411_v2  ;;  %v424_v7 = vrot.slane %v423_v5, 1 }
 0x1e3   :  { %v425_v8 = vadd.f32 %v424_v7, %v423_v5  ;;  %v415_v9 = vmul.f32 0.25, %v413_v6 }
 0x1e5   :  { %v426_v10 = vmul.f32 0.25, %v425_v8 }
 0x1e7   :  { %v427_v11 = vsel %vm406_vm6, %v415_v9, %v426_v10 }
 0x1e8   :  { %v664_v12 = vmul.f32 -1.442695, %v427_v11 }
 0x1ea   :  { %779 = vpow2.f32 %v664_v12 }
 0x1f4   :  { %v780_v13 = vpop.eup %779 }
 0x1f5   :  { %v431_v14 = vadd.f32 1.0, %v780_v13 }
 0x1f7   :  { %781 = vrcp.f32 %v431_v14 }
 0x201   :  { %v782_v15 = vpop.eup %781 }
 0x202   :  { %v434_v16 = vsel %vm968_vm5, %v782_v15, 0.0 }
 0x203   :  { %575 = vperm.xlu1 %743, %v434_v16  }
 0x207   :  { %744 = vset.pattern.permute.xlu1 %v792_v17 }
 0x208   :  { %593 = vperm.xlu1 %744, %v434_v16  }
 0x263   :  { %v392_v19 = vpop.xlane.xlu0 %391 }
 0x264   :  { %v393_v20 = vsub.f32 %v390_v56, %v392_v19 }
 0x266   :  { %v394_v22 = vmul.f32 1.442695, %v393_v20 }
 0x268   :  { %783 = vpow2.f32 %v394_v22 }
 0x272   :  { %v784_v23 = vpop.eup %783 }
 0x273   :  { %v396_v24 = vsel %vm385_vm4, %v784_v23, 0.0 }
 0x274   :  { %397 = vadd.xlane.f32.xlu0 %v396_v24 }
 0x282   :  { %v576_v50 = vpop.permute.xlu1 %575 }
 0x287   :  { %v594_v51 = vpop.permute.xlu1 %593 }
 0x288   :  { %v596_v5 = vmul.f32 %v594_v51, %v571_v63 }
 0x28a   :  { %610 = vperm.xlu0 %745, %v434_v16  }
 0x301   :  { %v398_v41 = vpop.xlane.xlu0 %397 }
 0x302   :  { %785 = vrcp.f32 %v398_v41 }
 0x303   :  { %787 = vlog2.f32 %v398_v41 }
 0x309   :  { %v611_v1 = vpop.permute.xlu0 %610 }
 0x30a   :  { %v613_v6 = vmul.f32 %v611_v1, %v572_v0 }
 0x30c   :  { %v786_v42 = vpop.eup %785 }
 0x30d   :  { %v788_v43 = vpop.eup %787  ;;  %v400_v44 = vmul.f32 %v786_v42, %v396_v24 }
 0x30e   :  { %v402_v45 = vmul.f32 0.6931472, %v788_v43 }
 0x30f   :  { %435 = vrot.lane.b32.xlu1 %v400_v44, %s796_s5  ;;  %v445_v46 = vpack.c.bf16 %v400_v44, %v400_v44 }
 0x310   :  { %v403_v47 = vsub.f32 %v393_v20, %v402_v45 }
 0x311   :  { %669 = vmatmul.mubr.msk.bf16.vlgmr.msra.gmra.mrb[4].mxu1 %vm458_vm9, %v445_v46  ;;  %670 = vmatmul.mubr.msk.bf16.vlgmr.msra.gmra.mrb[8].mxu0 %vm458_vm9, %v445_v46 }
 0x312   :  { %v404_v49 = vsel %vm385_vm4, %v403_v47, 0.0 }
 0x313   :  { %438 = vrot.lane.b32.xlu1 %v404_v49, %s797_s22 }
 0x317   :  { %441 = vrot.lane.b32.xlu1 %v434_v16, %s798_s23 }
 0x381   :  { %v436_v53 = vpop.permute.xlu1 %435 }
 0x382   :  { %v437_v55 = vadd.f32 %v436_v53, %v972_v52  ;;  %v570_v52 = vsel %vm406_vm6, %v560_v48, %v566_v60 }
 0x383   :  { %v578_v4 = vmul.f32 %v576_v50, %v570_v52 }
 0x385   :  { %v439_v54 = vpop.permute.xlu1 %438 }
 0x386   :  { %v440_v56 = vadd.f32 %v439_v54, %v437_v55 }
 0x389   :  { %v442_v57 = vpop.permute.xlu1 %441 }
 0x38a   :  { %v443_v58 = vadd.f32 %v442_v57, %v440_v56 }
 0x38c   :  { %444 = vst [vmem:[%s1020_s7] sm:$0xff] %v443_v58 }
 0x3e4   :  { %v512_v2 = vpop.f32.mrb[4].mxu1  ;;  %v553_v3 = vpop.f32.mrb[8].mxu0 }
 0x3e5   :  { %v514_v7 = vpop.f32.mrb[5].mxu1  ;;  %v555_v8 = vpop.f32.mrb[9].mxu0 }
 0x3e6   :  { %v579_v9 = vmul.f32 %v555_v8, %v512_v2  ;;  %v580_v10 = vsub.f32 1.0, %v555_v8  ;;  %v597_v11 = vmul.f32 %v555_v8, %v514_v7  ;;  %v614_v12 = vmul.f32 %v555_v8, %v553_v3  ;;  %v516_v13 = vpop.f32.mrb[6].mxu1  ;;  %v557_v14 = vpop.f32.mrb[10].mxu0 }
 0x3e7   :  { %v517_v15 = vpop.f32.mrb[7].mxu1  ;;  %v558_v16 = vpop.f32.mrb[11].mxu0 }
 0x3e8   :  { %v581_v17 = vmul.f32 %v580_v10, %v578_v4  ;;  %v598_v18 = vmul.f32 %v596_v5, %v580_v10  ;;  %v615_v19 = vmul.f32 %v613_v6, %v580_v10 }
 0x3ea   :  { %v582_v20 = vadd.f32 %v581_v17, %v579_v9  ;;  %v599_v22 = vadd.f32 %v598_v18, %v597_v11  ;;  %v616_v23 = vadd.f32 %v615_v19, %v614_v12 }
 0x3ec   :  { %v583_v24 = vsub.f32 %v582_v20, %v932_v26  ;;  %v600_v25 = vsub.f32 %v599_v22, %v915_v21  ;;  %v617_v27 = vsub.f32 %v616_v23, %v940_v28 }
 0x3ee   :  { %v584_v29 = vmul.f32 %v583_v24, %v583_v24  ;;  %v601_v30 = vmul.f32 %v600_v25, %v600_v25  ;;  %v618_v31 = vmul.f32 %v617_v27, %v617_v27 }
 0x3f0   :  { %v585_v32 = vrot.slane %v584_v29, 4  ;;  %v602_v33 = vrot.slane %v601_v30, 4  ;;  %v619_v34 = vrot.slane %v618_v31, 4 }
 0x3f2   :  { %v586_v35 = vadd.f32 %v585_v32, %v584_v29  ;;  %v603_v36 = vadd.f32 %v602_v33, %v601_v30  ;;  %v620_v37 = vadd.f32 %v619_v34, %v618_v31 }
 0x3f4   :  { %v587_v38 = vrot.slane %v586_v35, 2  ;;  %v604_v39 = vrot.slane %v603_v36, 2  ;;  %v621_v40 = vrot.slane %v620_v37, 2 }
 0x3f6   :  { %v588_v41 = vadd.f32 %v587_v38, %v586_v35  ;;  %v605_v42 = vadd.f32 %v604_v39, %v603_v36  ;;  %v622_v43 = vadd.f32 %v621_v40, %v620_v37 }
 0x3f8   :  { %v589_v26 = vrot.slane %v588_v41, 1  ;;  %v606_v44 = vrot.slane %v605_v42, 1  ;;  %v623_v21 = vrot.slane %v622_v43, 1 }
 0x3fa   :  { %v590_v45 = vadd.f32 %v589_v26, %v588_v41  ;;  %v607_v28 = vadd.f32 %v606_v44, %v605_v42  ;;  %v624_v47 = vadd.f32 %v623_v21, %v622_v43 }
 0x3fc   :  { %v608_v46 = vadd.f32 %v607_v28, %v590_v45 }
 0x3fe   :  { %v625_v49 = vadd.f32 %v624_v47, %v608_v46 }
 0x400   :  { %626 = vst [vmem:[%s1022_s8] sm:$0x1] %v625_v49 }

</bundles_post_ra>
